<compile_context>
chip_gen: v6e
topology: v6e:2x2x1
jax: 0.10.0
libtpu: 0.0.40
codegen_flags: <defaults>
</compile_context>

<pallas_src>
import functools

import jax
import jax.numpy as jnp
from jax import lax
from jax.experimental import pallas as pl
from jax.experimental.pallas import tpu as pltpu

_LANE = 128      # lane width (last-dim granule)
_SUBLANE = 8     # sublane granule (second-to-last dim)


def _round_up(x, m):
    return ((x + m - 1) // m) * m


def _mlp_kernel(num_layers, out_size, *refs):
    """refs: x_ref, (w_ref, b_ref) * num_layers, o_ref.

    x_ref is an f32 (tb, in_dim) block (K unpadded); weights are (K, N_pad) bf16
    with N padded to 128 lanes (and K padded to the previous layer's padded N for
    layers > 0); biases are (1, N_pad) f32.  The last (w, b) pair is the output
    layer (no relu); its padded class lanes are masked to -inf before
    log_softmax so the normalizer is exact.  Output is stored bf16, lane-dense.
    """
    x_ref = refs[0]
    layer_refs = refs[1: 1 + 2 * num_layers]
    o_ref = refs[-1]

    # In-kernel f32 -> bf16 cast (removes the wrapper pre-pass / extra HBM pass).
    h = x_ref[...].astype(jnp.bfloat16)

    # Hidden layers: linear -> relu.  Dropout is identity at inference.
    # TODO(synk): train-mode dropout (random masking with pltpu.prng_*) not implemented.
    for i in range(num_layers - 1):
        w_ref = layer_refs[2 * i]
        b_ref = layer_refs[2 * i + 1]
        acc = jnp.dot(h, w_ref[...], preferred_element_type=jnp.float32)
        acc = acc + b_ref[...]                        # f32 bias add
        h = jnp.maximum(acc, 0.0).astype(jnp.bfloat16)

    # Output layer (keep logits in f32).
    wo_ref = layer_refs[-2]
    bo_ref = layer_refs[-1]
    logits = jnp.dot(h, wo_ref[...], preferred_element_type=jnp.float32) + bo_ref[...]

    # Mask padded class lanes so they don't corrupt the max / logsumexp.
    col = lax.broadcasted_iota(jnp.int32, logits.shape, 1)
    logits = jnp.where(col < out_size, logits, -jnp.inf)

    # Numerically stable log_softmax along the class (lane) axis.
    m = jnp.max(logits, axis=1, keepdims=True)
    shifted = logits - m
    lse = jnp.log(jnp.sum(jnp.exp(shifted), axis=1, keepdims=True))
    o_ref[...] = (shifted - lse).astype(o_ref.dtype)   # bf16 lane-dense store


def prepare_params(params):
    """One-time parameter prep (hoisted out of the per-call hot path).

    params: list of (W, b) in PyTorch Linear convention W:(out,in), b:(out,).
    Returns list of (W_T_bf16:(K, N_pad), b_f32:(1, N_pad)) where N is padded to
    128 lanes and K is padded only for layers > 0 (to match the previous layer's
    padded output width); the first layer keeps K = input_size so the streamed
    activation needs no K padding.
    """
    prepped = []
    for li, (w, b) in enumerate(params):
        w = jnp.asarray(w, jnp.float32)
        b = jnp.asarray(b, jnp.float32)
        out_dim, in_dim = w.shape
        in_p = in_dim if li == 0 else _round_up(in_dim, _LANE)
        out_p = _round_up(out_dim, _LANE)
        wt = jnp.zeros((in_p, out_p), jnp.float32).at[:in_dim, :out_dim].set(w.T)
        bp = jnp.zeros((1, out_p), jnp.float32).at[0, :out_dim].set(b)
        prepped.append((wt.astype(jnp.bfloat16), bp))
    return prepped


def _pick_batch_tile(batch, batch_tile):
    """Big tiles for low per-step overhead, but >= 2 grid steps when the batch
    allows it so the 'parallel' axis can shard across both v7x TensorCores."""
    if batch >= 2 * _SUBLANE:
        tb = min(batch_tile, _round_up(pl.cdiv(batch, 2), _SUBLANE))
    else:
        tb = batch  # tiny batch: single full-dim block (legal: equals array dim)
    return tb


def classifier_forward(x, prepped, out_size, *, batch_tile=1024):
    """Forward pass.  x: (batch, input_size) f32 (passed unpadded, cast in-kernel).
    prepped: from prepare_params."""
    num_layers = len(prepped)
    batch, in_dim = x.shape
    assert prepped[0][0].shape[0] == in_dim
    class_p = prepped[-1][0].shape[1]

    tb = _pick_batch_tile(batch, batch_tile)
    n_steps = pl.cdiv(batch, tb)   # last block may be partial; OOB rows are masked
    grid = (n_steps,)

    # Streamed activation: f32, K unpadded (last dim == full array dim -> legal).
    flat_args = [x]
    in_specs = [pl.BlockSpec((tb, in_dim), lambda i: (i, 0))]
    for w, b in prepped:
        flat_args += [w, b]
        # Constant index maps -> weights/biases stay VMEM-resident across steps.
        in_specs += [
            pl.BlockSpec(w.shape, lambda i: (0, 0)),
            pl.BlockSpec(b.shape, lambda i: (0, 0)),
        ]
    # Lane-dense bf16 output block (padded class lanes hold -inf, sliced below).
    out_specs = pl.BlockSpec((tb, class_p), lambda i: (i, 0))

    # Advisory cost estimate (real traffic: unpadded f32 input, bf16 output).
    flops = 0
    bytes_accessed = batch * in_dim * 4 + batch * class_p * 2
    for w, b in prepped:
        flops += 2 * batch * w.shape[0] * w.shape[1]
        bytes_accessed += w.size * 2 + b.size * 4
    cost = pl.CostEstimate(
        flops=flops,
        transcendentals=batch * class_p,
        bytes_accessed=bytes_accessed,
    )

    kernel = functools.partial(_mlp_kernel, num_layers, out_size)
    out_padded = pl.pallas_call(
        kernel,
        out_shape=jax.ShapeDtypeStruct((batch, class_p), jnp.bfloat16),
        grid=grid,
        in_specs=in_specs,
        out_specs=out_specs,
        compiler_params=pltpu.CompilerParams(dimension_semantics=("parallel",)),
        cost_estimate=cost,
    )(*flat_args)

    # Slice the real classes and return f32 log-probs (XLA fuses slice+convert).
    # A downstream consumer (argmax / NLL) could instead be fused into the kernel
    # or consume the padded bf16 buffer directly to avoid even this tiny op.
    return out_padded[:, :out_size].astype(jnp.float32)


def _init_params(key, input_size, output_size, hidden_layers):
    """Deterministic init matching the module's layer shapes (PyTorch convention)."""
    sizes = [input_size] + list(hidden_layers) + [output_size]
    params = []
    for i in range(len(sizes) - 1):
        fan_in, fan_out = sizes[i], sizes[i + 1]
        key, kw, kb = jax.random.split(key, 3)
        bound = 1.0 / jnp.sqrt(fan_in)
        w = jax.random.uniform(kw, (fan_out, fan_in), jnp.float32, -bound, bound)
        b = jax.random.uniform(kb, (fan_out,), jnp.float32, -bound, bound)
        params.append((w, b))
    return params


def _reference_forward(x, params):
    """Pure-JAX f32 reference for sanity checking."""
    h = x
    for w, b in params[:-1]:
        h = jnp.maximum(h @ w.T + b, 0.0)
    w, b = params[-1]
    logits = h @ w.T + b
    return jax.nn.log_softmax(logits, axis=1)


if __name__ == "__main__":
    # Small shapes consistent with the module: Classifier(32, 10, [64, 32], drop_p=0.5)
    input_size, output_size, hidden_layers = 32, 10, [64, 32]

    key = jax.random.PRNGKey(0)
    params = _init_params(key, input_size, output_size, hidden_layers)
    prepped = prepare_params(params)   # one-time weight transpose/pad/bf16-cast

    # --- small-batch check (batch=8, single grid step) ---
    key, kx = jax.random.split(key)
    x = jax.random.normal(kx, (8, input_size), jnp.float32)
    out = jax.block_until_ready(classifier_forward(x, prepped, output_size))
    ref = _reference_forward(x, params)
    assert out.shape == (8, output_size)
    assert bool(jnp.all(jnp.isfinite(out)))
    # bf16 MXU operands + bf16 output store (f32 accumulation) -> loosened tolerance.
    assert jnp.allclose(out, ref, atol=5e-2, rtol=5e-2)

    # --- larger-batch check exercising the batch grid (grid=(2,), tb=256) ---
    key, kx2 = jax.random.split(key)
    x2 = jax.random.normal(kx2, (512, input_size), jnp.float32)
    out2 = jax.block_until_ready(classifier_forward(x2, prepped, output_size))
    ref2 = _reference_forward(x2, params)
    assert out2.shape == (512, output_size)
    assert bool(jnp.all(jnp.isfinite(out2)))
    assert jnp.allclose(out2, ref2, atol=5e-2, rtol=5e-2)

    print("KERNEL_OK")
</pallas_src>

<mosaic_0001>
module attributes {stable_mosaic.version = 11 : i64} {
  func.func @_mlp_kernel(%arg0: i32, %arg1: memref<8x32xf32, #tpu.memory_space<vmem>>, %arg2: memref<32x128xbf16, #tpu.memory_space<vmem>>, %arg3: memref<1x128xf32, #tpu.memory_space<vmem>>, %arg4: memref<128x128xbf16, #tpu.memory_space<vmem>>, %arg5: memref<1x128xf32, #tpu.memory_space<vmem>>, %arg6: memref<128x128xbf16, #tpu.memory_space<vmem>>, %arg7: memref<1x128xf32, #tpu.memory_space<vmem>>, %arg8: memref<8x128xbf16, #tpu.memory_space<vmem>>) attributes {dimension_semantics = [#tpu.dimension_semantics<parallel>], iteration_bounds = array<i64: 1>, scalar_prefetch = 0 : i64, scratch_operands = 0 : i64, tpu.core_type = #tpu.core_type<tc>, window_params = [{transform_indices = @transform_0, window_bounds = array<i64: 8, 32>}, {pipeline_mode = #tpu.pipeline_mode<synchronous>, transform_indices = @transform_1, window_bounds = array<i64: 32, 128>}, {pipeline_mode = #tpu.pipeline_mode<synchronous>, transform_indices = @transform_2, window_bounds = array<i64: 1, 128>}, {pipeline_mode = #tpu.pipeline_mode<synchronous>, transform_indices = @transform_3, window_bounds = array<i64: 128, 128>}, {pipeline_mode = #tpu.pipeline_mode<synchronous>, transform_indices = @transform_4, window_bounds = array<i64: 1, 128>}, {pipeline_mode = #tpu.pipeline_mode<synchronous>, transform_indices = @transform_5, window_bounds = array<i64: 128, 128>}, {pipeline_mode = #tpu.pipeline_mode<synchronous>, transform_indices = @transform_6, window_bounds = array<i64: 1, 128>}, {transform_indices = @transform_7, window_bounds = array<i64: 8, 128>}]} {
    %c0 = arith.constant 0 : index
    %c0_0 = arith.constant 0 : index
    %0 = vector.load %arg1[%c0, %c0_0] : memref<8x32xf32, #tpu.memory_space<vmem>>, vector<8x32xf32>
    %1 = arith.truncf %0 : vector<8x32xf32> to vector<8x32xbf16>
    %c0_1 = arith.constant 0 : index
    %c0_2 = arith.constant 0 : index
    %2 = vector.load %arg2[%c0_1, %c0_2] : memref<32x128xbf16, #tpu.memory_space<vmem>>, vector<32x128xbf16>
    %cst = arith.constant dense<0.000000e+00> : vector<8x128xf32>
    %3 = tpu.matmul %1, %2, %cst {dimension_numbers = #tpu.dot_dimension_numbers<[1], [0], [0], [1], [0, 0, 1, 1], [], []>} : vector<8x32xbf16>, vector<32x128xbf16>, vector<8x128xf32> -> vector<8x128xf32>
    %c0_3 = arith.constant 0 : index
    %c0_4 = arith.constant 0 : index
    %4 = vector.load %arg3[%c0_3, %c0_4] : memref<1x128xf32, #tpu.memory_space<vmem>>, vector<1x128xf32>
    %5 = vector.broadcast %4 : vector<1x128xf32> to vector<8x128xf32>
    %6 = arith.addf %3, %5 : vector<8x128xf32>
    %cst_5 = arith.constant 0.000000e+00 : f32
    %7 = vector.broadcast %cst_5 : f32 to vector<8x128xf32>
    %8 = arith.maximumf %6, %7 : vector<8x128xf32>
    %9 = arith.truncf %8 : vector<8x128xf32> to vector<8x128xbf16>
    %c0_6 = arith.constant 0 : index
    %c0_7 = arith.constant 0 : index
    %10 = vector.load %arg4[%c0_6, %c0_7] : memref<128x128xbf16, #tpu.memory_space<vmem>>, vector<128x128xbf16>
    %cst_8 = arith.constant dense<0.000000e+00> : vector<8x128xf32>
    %11 = tpu.matmul %9, %10, %cst_8 {dimension_numbers = #tpu.dot_dimension_numbers<[1], [0], [0], [1], [0, 0, 1, 1], [], []>} : vector<8x128xbf16>, vector<128x128xbf16>, vector<8x128xf32> -> vector<8x128xf32>
    %c0_9 = arith.constant 0 : index
    %c0_10 = arith.constant 0 : index
    %12 = vector.load %arg5[%c0_9, %c0_10] : memref<1x128xf32, #tpu.memory_space<vmem>>, vector<1x128xf32>
    %13 = vector.broadcast %12 : vector<1x128xf32> to vector<8x128xf32>
    %14 = arith.addf %11, %13 : vector<8x128xf32>
    %cst_11 = arith.constant 0.000000e+00 : f32
    %15 = vector.broadcast %cst_11 : f32 to vector<8x128xf32>
    %16 = arith.maximumf %14, %15 : vector<8x128xf32>
    %17 = arith.truncf %16 : vector<8x128xf32> to vector<8x128xbf16>
    %c0_12 = arith.constant 0 : index
    %c0_13 = arith.constant 0 : index
    %18 = vector.load %arg6[%c0_12, %c0_13] : memref<128x128xbf16, #tpu.memory_space<vmem>>, vector<128x128xbf16>
    %cst_14 = arith.constant dense<0.000000e+00> : vector<8x128xf32>
    %19 = tpu.matmul %17, %18, %cst_14 {dimension_numbers = #tpu.dot_dimension_numbers<[1], [0], [0], [1], [0, 0, 1, 1], [], []>} : vector<8x128xbf16>, vector<128x128xbf16>, vector<8x128xf32> -> vector<8x128xf32>
    %c0_15 = arith.constant 0 : index
    %c0_16 = arith.constant 0 : index
    %20 = vector.load %arg7[%c0_15, %c0_16] : memref<1x128xf32, #tpu.memory_space<vmem>>, vector<1x128xf32>
    %21 = vector.broadcast %20 : vector<1x128xf32> to vector<8x128xf32>
    %22 = arith.addf %19, %21 : vector<8x128xf32>
    %23 = tpu.iota {dimensions = array<i32: 1>} : vector<8x128xi32>
    %c10_i32 = arith.constant 10 : i32
    %24 = vector.broadcast %c10_i32 : i32 to vector<8x128xi32>
    %25 = arith.cmpi slt, %23, %24 : vector<8x128xi32>
    %cst_17 = arith.constant 0xFF800000 : f32
    %26 = vector.broadcast %cst_17 : f32 to vector<8x128xf32>
    %27 = arith.select %25, %22, %26 : vector<8x128xi1>, vector<8x128xf32>
    %cst_18 = arith.constant dense<0xFF800000> : vector<8xf32>
    %28 = vector.multi_reduction <maximumf>, %27, %cst_18 [1] : vector<8x128xf32> to vector<8xf32>
    %29 = vector.shape_cast %28 : vector<8xf32> to vector<8x1xf32>
    %30 = vector.broadcast %29 : vector<8x1xf32> to vector<8x128xf32>
    %31 = arith.subf %27, %30 : vector<8x128xf32>
    %32 = math.exp %31 : vector<8x128xf32>
    %cst_19 = arith.constant dense<0.000000e+00> : vector<8xf32>
    %33 = vector.multi_reduction <add>, %32, %cst_19 [1] : vector<8x128xf32> to vector<8xf32>
    %34 = vector.shape_cast %33 : vector<8xf32> to vector<8x1xf32>
    %35 = math.log %34 : vector<8x1xf32>
    %36 = vector.broadcast %35 : vector<8x1xf32> to vector<8x128xf32>
    %37 = arith.subf %31, %36 : vector<8x128xf32>
    %38 = arith.truncf %37 : vector<8x128xf32> to vector<8x128xbf16>
    %c0_20 = arith.constant 0 : index
    %c0_21 = arith.constant 0 : index
    %39 = vector.load %arg8[%c0_20, %c0_21] : memref<8x128xbf16, #tpu.memory_space<vmem>>, vector<8x128xbf16>
    tpu.vector_store %arg8[%c0_20, %c0_21], %38 {strides = array<i32>} : memref<8x128xbf16, #tpu.memory_space<vmem>>, vector<8x128xbf16>,
    return
  }
  func.func @transform_0(%arg0: i32) -> (i32, i32) {
    %c0_i32 = arith.constant 0 : i32
    %c0_i32_0 = arith.constant 0 : i32
    return %arg0, %c0_i32 : i32, i32
  }
  func.func @transform_1(%arg0: i32) -> (i32, i32) {
    %c0_i32 = arith.constant 0 : i32
    %c0_i32_0 = arith.constant 0 : i32
    %c0_i32_1 = arith.constant 0 : i32
    return %c0_i32, %c0_i32_0 : i32, i32
  }
  func.func @transform_2(%arg0: i32) -> (i32, i32) {
    %c0_i32 = arith.constant 0 : i32
    %c0_i32_0 = arith.constant 0 : i32
    %c0_i32_1 = arith.constant 0 : i32
    return %c0_i32, %c0_i32_0 : i32, i32
  }
  func.func @transform_3(%arg0: i32) -> (i32, i32) {
    %c0_i32 = arith.constant 0 : i32
    %c0_i32_0 = arith.constant 0 : i32
    %c0_i32_1 = arith.constant 0 : i32
    return %c0_i32, %c0_i32_0 : i32, i32
  }
  func.func @transform_4(%arg0: i32) -> (i32, i32) {
    %c0_i32 = arith.constant 0 : i32
    %c0_i32_0 = arith.constant 0 : i32
    %c0_i32_1 = arith.constant 0 : i32
    return %c0_i32, %c0_i32_0 : i32, i32
  }
  func.func @transform_5(%arg0: i32) -> (i32, i32) {
    %c0_i32 = arith.constant 0 : i32
    %c0_i32_0 = arith.constant 0 : i32
    %c0_i32_1 = arith.constant 0 : i32
    return %c0_i32, %c0_i32_0 : i32, i32
  }
  func.func @transform_6(%arg0: i32) -> (i32, i32) {
    %c0_i32 = arith.constant 0 : i32
    %c0_i32_0 = arith.constant 0 : i32
    %c0_i32_1 = arith.constant 0 : i32
    return %c0_i32, %c0_i32_0 : i32, i32
  }
  func.func @transform_7(%arg0: i32) -> (i32, i32) {
    %c0_i32 = arith.constant 0 : i32
    %c0_i32_0 = arith.constant 0 : i32
    return %arg0, %c0_i32 : i32, i32
  }
}

</mosaic_0001>

<bundles_post_ra>
// kernel: tpu_custom_call.1
= control target key start
LH: loop header
LB: loop body
LE: loop exit
PB: predicated region body
PF: predicated region fallthrough
CT: control target
= control target key end

     0   :  { %12 = vsyncpa [#allocation3], 0  ;;  %s745_s0 = inlined_call_operand.hbm [shape: f32[8,32], index: 0, kind: input, shape index: {}]   ;;  %s746_s1 = inlined_call_operand.hbm [shape: bf16[32,128], index: 1, kind: input, shape index: {}]   ;;  %s747_s2 = inlined_call_operand.vmem [shape: f32[1,128], index: 2, kind: input, shape index: {}]   ;;  %s748_s3 = inlined_call_operand.hbm [shape: bf16[128,128], index: 3, kind: input, shape index: {}]   ;;  %s749_s4 = inlined_call_operand.vmem [shape: f32[1,128], index: 4, kind: input, shape index: {}]   ;;  %s750_s5 = inlined_call_operand.hbm [shape: bf16[128,128], index: 5, kind: input, shape index: {}]   ;;  %s751_s6 = inlined_call_operand.vmem [shape: f32[1,128], index: 6, kind: input, shape index: {}]   ;;  %s752_s7 = inlined_call_operand.hbm [shape: bf16[8,128], index: 7, kind: output, shape index: {}]  }
   0x1   :  { %13 = vsyncpa [#allocation6], 0 }
   0x2   :  { %14 = vsyncpa [#allocation9], 0 }
   0x3   :  { %15 = vsyncpa [#allocation4], 0  ;;  %s639_s24 = smov [#allocation5]  }
   0x4   :  { %s31_s25 = sshll.u32 %s639_s24, 4  ;;  %s32_s25 = int_to_ptr.vmem [resolvable:$true] %s31_s25 }
   0x5   :  { %s539_s26 = scalar_lea.vmem %s32_s25, 256  ;;  %p544_p1 = scmp.lt.s32.totalorder %s32_s25, %s32_s25 }
   0x6   :  { %p540_p0 = scmp.ne.s32.totalorder %s32_s25, %s539_s26  ;;  %p545_p2 = scmp.lt.s32.totalorder %s539_s26, %s539_s26 }
   0x8   :  { %p546_p3 = por %p545_p2, %p544_p1 }
   0xa   :  { %p547_p4 = pnand %p546_p3, %p540_p0 }
   0xc   :  { %550 = shalt.err (!%p547_p4)
}
   0xd   :  { %s640_s27 = smov 64   ;;  %s641_s28 = smov 4  }
   0xe   :  { %37 = dma.hbm_to_vmem [thread:$0]  %s746_s1, 256, %s32_s25, [#allocation6], %s640_s27, %s640_s27, %s641_s28  }
   0xf   :  { %s642_s8 = smov [#allocation2]   ;;  %s643_s10 = smov [#allocation7]  }
  0x10   :  { %s22_s9 = sshll.u32 %s642_s8, 4  ;;  %s45_s11 = sshll.u32 %s643_s10, 4  ;;  %s23_s9 = int_to_ptr.vmem [resolvable:$true] %s22_s9  ;;  %s46_s11 = int_to_ptr.vmem [resolvable:$true] %s45_s11 }
  0x11   :  { %s559_s12 = scalar_lea.vmem %s23_s9, 128  ;;  %p564_p6 = scmp.lt.s32.totalorder %s23_s9, %s23_s9 }
  0x12   :  { %p560_p5 = scmp.ne.s32.totalorder %s23_s9, %s559_s12  ;;  %p565_p7 = scmp.lt.s32.totalorder %s559_s12, %s559_s12 }
  0x14   :  { %p566_p8 = por %p565_p7, %p564_p6 }
  0x16   :  { %p567_p9 = pnand %p566_p8, %p560_p5 }
  0x18   :  { %570 = shalt.err (!%p567_p9)
}
  0x19   :  { %25 = dma.hbm_to_vmem [thread:$0]  %s745_s0, 128, %s23_s9, [#allocation3]  }
  0x1a   :  { %s579_s15 = scalar_lea.vmem %s46_s11, 1024  ;;  %p584_p11 = scmp.lt.s32.totalorder %s46_s11, %s46_s11 }
  0x1b   :  { %p580_p10 = scmp.ne.s32.totalorder %s46_s11, %s579_s15  ;;  %p585_p12 = scmp.lt.s32.totalorder %s579_s15, %s579_s15 }
  0x1d   :  { %p586_p13 = por %p585_p12, %p584_p11 }
  0x1f   :  { %p587_p0 = pnand %p586_p13, %p580_p10 }
  0x21   :  { %590 = shalt.err (!%p587_p0)
}
  0x22   :  { %51 = dma.hbm_to_vmem [thread:$0]  %s748_s3, 1024, %s46_s11, [#allocation6], %s640_s27, %s640_s27, %s641_s28  }
  0x23   :  { %s644_s17 = smov [#allocation8]  }
  0x24   :  { %s59_s18 = sshll.u32 %s644_s17, 4  ;;  %s60_s18 = int_to_ptr.vmem [resolvable:$true] %s59_s18 }
  0x25   :  { %s599_s19 = scalar_lea.vmem %s60_s18, 1024  ;;  %p604_p2 = scmp.lt.s32.totalorder %s60_s18, %s60_s18 }
  0x26   :  { %p600_p1 = scmp.ne.s32.totalorder %s60_s18, %s599_s19  ;;  %p605_p3 = scmp.lt.s32.totalorder %s599_s19, %s599_s19 }
  0x28   :  { %p606_p4 = por %p605_p3, %p604_p2 }
  0x2a   :  { %p607_p5 = pnand %p606_p4, %p600_p1 }
  0x2c   :  { %610 = shalt.err (!%p607_p5)
}
  0x2d   :  { %65 = dma.hbm_to_vmem [thread:$0]  %s750_s5, 1024, %s60_s18, [#allocation9], %s640_s27, %s640_s27, %s641_s28  }
  0x2e   :  { %631 = dma.done.wait [#allocation3], 128  }
  0x2f   :  { %632 = vsyncadd [#allocation3], 4294967168 }
  0x30   :  { %633 = dma.done.wait [#allocation6], 1280  }
  0x31   :  { %634 = vsyncadd [#allocation6], 4294966016 }
  0x32   :  { %635 = dma.done.wait [#allocation9], 1024  }
  0x33   :  { %636 = vsyncadd [#allocation9], 4294966272  ;;  %v645_v0 = vmov 0.0   ;;  %vm646_vm0 = vmmov 0   ;;  %v509_v1 = vld [vmem:[#allocation5 + $0x8] sm:$0xff]   ;;  %v510_v2 = vld [vmem:[#allocation5] sm:$0xff]   ;;  %v376_v37 = vlaneseq }
  0x34   :  { %452 = vmatprep.subr.bf16.mxu0 %v645_v0  ;;  %456 = vmatprep.mubr.msk.bf16.mxu0 %vm646_vm0, %v645_v0  ;;  %v81_v3 = vld [vmem:[#allocation2] sm:$0xff]  ;;  %v511_v4 = vld [vmem:[#allocation7 + $0x38] sm:$0xff]   ;;  %v512_v6 = vld [vmem:[#allocation7 + $0x30] sm:$0xff]   ;;  %vm106_vm1 = vcmask 261120  }
  0x35   :  { %460 = vmatprep.subr.bf16.mxu1 %v645_v0  ;;  %476 = vmatprep.mubr.msk.bf16.mxu1 %vm646_vm0, %v645_v0  ;;  %v82_v5 = vpack.c.bf16 %v81_v3, %v81_v3  ;;  %v513_v7 = vld [vmem:[#allocation7 + $0x28] sm:$0xff]   ;;  %v514_v8 = vld [vmem:[#allocation7 + $0x20] sm:$0xff]   ;;  %v515_v9 = vld [vmem:[#allocation7 + $0x18] sm:$0xff]   ;;  %v377_v38 = vand.u32 127, %v376_v37 }
  0x36   :  { %453 = vmatpush3.bf16.msra.mxu0 %v509_v1  ;;  %461 = vmatpush3.bf16.msra.mxu1 %v511_v4  ;;  %v516_v10 = vld [vmem:[#allocation7 + $0x10] sm:$0xff]   ;;  %v517_v11 = vld [vmem:[#allocation7 + $0x8] sm:$0xff]   ;;  %v518_v12 = vld [vmem:[#allocation7] sm:$0xff]  }
  0x37   :  { %454 = vmatprep.subr.bf16.mxu0 %v645_v0  ;;  %462 = vmatprep.subr.bf16.mxu1 %v645_v0  ;;  %v519_v13 = vld [vmem:[#allocation8 + $0x38] sm:$0xff]   ;;  %v520_v14 = vld [vmem:[#allocation8 + $0x30] sm:$0xff]   ;;  %v521_v15 = vld [vmem:[#allocation8 + $0x28] sm:$0xff]   ;;  %vm378_vm2 = vcmp.lt.s32.totalorder %v377_v38, 10 }
  0x38   :  { %v522_v16 = vld [vmem:[#allocation8 + $0x20] sm:$0xff]   ;;  %v523_v17 = vld [vmem:[#allocation8 + $0x18] sm:$0xff]   ;;  %v524_v18 = vld [vmem:[#allocation8 + $0x10] sm:$0xff]  }
  0x39   :  { %v409_v19 = vld [vmem:[%s747_s2] ss:$0 sm:$0xff]  ;;  %v526_v28 = vld [vmem:[#allocation8] sm:$0xff]  }
  0x3a   :  { %455 = vmatpush3.bf16.msra.mxu0 %v510_v2  ;;  %463 = vmatpush3.bf16.msra.mxu1 %v512_v6  ;;  %v525_v27 = vld [vmem:[#allocation8 + $0x8] sm:$0xff]  }
  0x3b   :  { %480 = vmatprep.subr.bf16.mxu0 %v645_v0  ;;  %464 = vmatprep.subr.bf16.mxu1 %v645_v0  ;;  %v413_v29 = vld [vmem:[%s749_s4] ss:$0 sm:$0xff]  ;;  %s647_s4 = smov [#allocation10]  }
  0x3c   :  { %v422_v39 = vld [vmem:[%s751_s6] ss:$0 sm:$0xff]  ;;  %s398_s6 = sshll.u32 %s647_s4, 4  ;;  %s399_s6 = int_to_ptr.vmem [resolvable:$true] %s398_s6 }
  0x3d   :  { %457 = vmatmul.mubr.msk.bf16.vlgmr.msra.gmra.mxu0 %vm106_vm1, %v82_v5  ;;  %s611_s24 = scalar_lea.vmem %s399_s6, 64  ;;  %p616_p7 = scmp.lt.s32.totalorder %s399_s6, %s399_s6 }
  0x3e   :  { %496 = vmatprep.mubr.msk.bf16.mxu0 %vm646_vm0, %v645_v0  ;;  %465 = vmatpush3.bf16.msra.mxu1 %v513_v7  ;;  %p612_p6 = scmp.ne.s32.totalorder %s399_s6, %s611_s24  ;;  %p617_p8 = scmp.lt.s32.totalorder %s611_s24, %s611_s24 }
  0x3f   :  { %466 = vmatprep.subr.bf16.mxu1 %v645_v0  ;;  %481 = vmatpush3.bf16.msra.mxu0 %v519_v13 }
  0x40   :  { %482 = vmatprep.subr.bf16.mxu0 %v645_v0  ;;  %p618_p9 = por %p617_p8, %p616_p7 }
  0x42   :  { %467 = vmatpush3.bf16.msra.mxu1 %v514_v8  ;;  %p619_p10 = pnand %p618_p9, %p612_p6 }
  0x43   :  { %468 = vmatprep.subr.bf16.mxu1 %v645_v0  ;;  %483 = vmatpush3.bf16.msra.mxu0 %v520_v14 }
  0x44   :  { %484 = vmatprep.subr.bf16.mxu0 %v645_v0 }
  0x46   :  { %469 = vmatpush3.bf16.msra.mxu1 %v515_v9 }
  0x47   :  { %470 = vmatprep.subr.bf16.mxu1 %v645_v0  ;;  %485 = vmatpush3.bf16.msra.mxu0 %v521_v15 }
  0x48   :  { %486 = vmatprep.subr.bf16.mxu0 %v645_v0 }
  0x4a   :  { %471 = vmatpush3.bf16.msra.mxu1 %v516_v10 }
  0x4b   :  { %472 = vmatprep.subr.bf16.mxu1 %v645_v0  ;;  %487 = vmatpush3.bf16.msra.mxu0 %v522_v16 }
  0x4c   :  { %488 = vmatprep.subr.bf16.mxu0 %v645_v0 }
  0x4e   :  { %473 = vmatpush3.bf16.msra.mxu1 %v517_v11 }
  0x4f   :  { %474 = vmatprep.subr.bf16.mxu1 %v645_v0  ;;  %489 = vmatpush3.bf16.msra.mxu0 %v523_v17 }
  0x50   :  { %490 = vmatprep.subr.bf16.mxu0 %v645_v0 }
  0x52   :  { %475 = vmatpush3.bf16.msra.mxu1 %v518_v12 }
  0x53   :  { %491 = vmatpush3.bf16.msra.mxu0 %v524_v18 }
  0x54   :  { %492 = vmatprep.subr.bf16.mxu0 %v645_v0 }
  0x57   :  { %493 = vmatpush3.bf16.msra.mxu0 %v525_v27 }
  0x58   :  { %494 = vmatprep.subr.bf16.mxu0 %v645_v0 }
  0x5b   :  { %495 = vmatpush3.bf16.msra.mxu0 %v526_v28 }
  0xfd   :  { %v144_v20 = vpop.f32.mrf.mxu0 }
  0xfe   :  { %v145_v21 = vadd.f32 %v409_v19, %v144_v20 }
  0xff   :  { %v458_v22 = vpop.f32.mrf.mxu0 }
 0x100   :  { %v150_v23 = vmax.f32 %v145_v21, 0.0 }
 0x101   :  { %v147_v24 = vpop.f32.mrf.mxu0 }
 0x102   :  { %v151_v25 = vpack.c.bf16 %v150_v23, %v150_v23 }
 0x103   :  { %v459_v26 = vpop.f32.mrf.mxu0 }
 0x104   :  { %477 = vmatmul.mubr.bf16.vlgmr.msra.gmra.mxu1 %v151_v25 }
 0x1c4   :  { %v257_v30 = vpop.f32.mrf.mxu1 }
 0x1c5   :  { %v258_v31 = vadd.f32 %v413_v29, %v257_v30 }
 0x1c6   :  { %v478_v32 = vpop.f32.mrf.mxu1 }
 0x1c7   :  { %v263_v33 = vmax.f32 %v258_v31, 0.0 }
 0x1c8   :  { %v260_v34 = vpop.f32.mrf.mxu1 }
 0x1c9   :  { %v264_v35 = vpack.c.bf16 %v263_v33, %v263_v33 }
 0x1ca   :  { %v479_v36 = vpop.f32.mrf.mxu1 }
 0x1cb   :  { %497 = vmatmul.mubr.bf16.vlgmr.msra.gmra.mxu0 %v264_v35 }
 0x28b   :  { %v370_v40 = vpop.f32.mrf.mxu0 }
 0x28c   :  { %v371_v41 = vadd.f32 %v422_v39, %v370_v40 }
 0x28d   :  { %v498_v42 = vpop.f32.mrf.mxu0 }
 0x28e   :  { %v379_v43 = vsel %vm378_vm2, %v371_v41, -inf }
 0x28f   :  { %380 = vmax.xlane.f32.xlu0 %v379_v43  ;;  %v373_v44 = vpop.f32.mrf.mxu0 }
 0x291   :  { %v499_v45 = vpop.f32.mrf.mxu0 }
 0x318   :  { %v381_v46 = vpop.xlane.xlu0 %380 }
 0x319   :  { %v382_v47 = vsub.f32 %v379_v43, %v381_v46 }
 0x31b   :  { %v383_v48 = vmul.f32 1.442695, %v382_v47 }
 0x31d   :  { %527 = vpow2.f32 %v383_v48 }
 0x32a   :  { %v528_v49 = vpop.eup %527 }
 0x32b   :  { %385 = vadd.xlane.f32.xlu0 %v528_v49 }
 0x3b4   :  { %v386_v50 = vpop.xlane.xlu0 %385 }
 0x3b5   :  { %529 = vlog2.f32 %v386_v50 }
 0x3c2   :  { %v530_v51 = vpop.eup %529 }
 0x3c3   :  { %v388_v52 = vmul.f32 0.6931472, %v530_v51 }
 0x3c5   :  { %v389_v53 = vsub.f32 %v382_v47, %v388_v52 }
 0x3c7   :  { %v390_v54 = vpack.c.bf16 %v389_v53, %v389_v53 }
 0x3c9   :  { %391 = vst [vmem:[#allocation10] sm:$0xf] %v390_v54 }
 0x3ca   :  { %622 = shalt.err (!%p619_p10)
}
 0x3cb   :  { %401 = dma.vmem_to_hbm [thread:$0]  %s399_s6, 64, %s752_s7, [#allocation4]  }
 0x3cc   :  { %637 = dma.done.wait [#allocation4], 64  }
 0x3cd   :  { %638 = vsyncadd [#allocation4], 4294967232 }
 0x3ce   :  { %405 = vsyncpa [#allocation3], 1 }
 0x3cf   :  { %406 = vsyncpa [#allocation6], 1 }
 0x3d0   :  { %407 = vsyncpa [#allocation9], 1 }
 0x3d1   :  { %408 = vsyncpa [#allocation4], 1 }

</bundles_post_ra>
